<compile_context>
chip_gen: v5e
topology: v5e:2x2
jax: 0.10.0
libtpu: 0.0.40
codegen_flags: <defaults>
</compile_context>

<pallas_src>
import math

import jax
import jax.numpy as jnp
from jax.experimental import pallas as pl
from jax.experimental.pallas import tpu as pltpu

_LANES = 128  # vreg lane width (fast axis)


def _relu_kernel(x_ref, o_ref):
    x = x_ref[...]
    o_ref[...] = jnp.maximum(x, jnp.zeros((), x.dtype))


def _prelu_kernel(alpha_ref, x_ref, o_ref):
    # alpha_ref lives in SMEM: single learnable PReLU parameter.
    x = x_ref[...]
    a = alpha_ref[0].astype(x.dtype)
    zero = jnp.zeros((), x.dtype)
    # Matches torch.nn.PReLU exactly: max(0, x) + a * min(0, x).
    o_ref[...] = jnp.maximum(x, zero) + a * jnp.minimum(x, zero)


def _round_up(v, m):
    return -(-v // m) * m


def _sublanes_for(dtype):
    # Minimum second-minor tile: f32 -> 8, bf16/f16 -> 16, int8/fp8 -> 32.
    itemsize = jnp.dtype(dtype).itemsize
    return max(8, 32 // max(1, itemsize))


def _default_row_block(dtype, sublanes):
    """Per-generation default row block (rows of 128 lanes)."""
    try:
        kind = jax.devices()[0].device_kind.lower()
    except Exception:
        kind = ""
    big_vmem = ("v6" in kind) or ("v7" in kind) or ("7x" in kind)
    # Bytes per tile buffer; double-buffered in + out => ~4x this live in VMEM.
    #   v6e / v7x : 4 MiB tiles (16 MiB working set, under the 32 MiB default).
    #   v5e & rest: 2 MiB tiles ( 8 MiB working set, under the 16 MiB default).
    tile_bytes = (4 << 20) if big_vmem else (2 << 20)
    rb = tile_bytes // (jnp.dtype(dtype).itemsize * _LANES)
    return max(sublanes, (rb // sublanes) * sublanes)


def _pick_row_block(rows, sublanes, rb_target):
    if rows <= rb_target:
        return rows  # single block covering the full dim (no (8,128) constraint)
    # Keep >= ~4 grid steps (v7x megacore sharding + DMA/compute overlap) while
    # never shrinking the block below rb_target / 4.
    rb = min(rb_target, _round_up(-(-rows // 4), sublanes))
    return max(rb, sublanes)


def activation(x, afunc="relu", prelu_weight=None, *, row_block=None,
               donate=False, min_pallas_elements=65536):
    """Forward pass of the Activation module.

    afunc: 'relu' (default), 'prelu', or None (identity).
    prelu_weight: scalar PReLU parameter (defaults to 0.25, the nn.PReLU init).
    donate: alias x's buffer with the output (only if the caller can donate x).
    """
    if afunc is None:
        return x  # nn.Identity: no compute, no kernel needed.
    if afunc not in ("relu", "prelu"):
        raise NotImplementedError(afunc)

    alpha = None
    if afunc == "prelu":
        if prelu_weight is None:
            prelu_weight = 0.25  # nn.PReLU default init
        alpha = jnp.asarray(prelu_weight, dtype=jnp.float32).reshape((1,))

    total = math.prod(x.shape)
    if total == 0:
        return x

    # Fallback: tiny tensors (fixed pallas_call overhead dominates) or totals
    # that cannot be viewed as a lane-dense (rows, 128) slab without a copy.
    # Plain XLA fused elementwise is already at the HBM roofline for these.
    # TODO(synk): a manual-DMA tail path could keep non-128-divisible totals in
    # Pallas, but it is not worth it for a pure elementwise op.
    if total < min_pallas_elements or total % _LANES != 0:
        zero = jnp.zeros((), x.dtype)
        if afunc == "relu":
            return jnp.maximum(x, zero)
        a = alpha[0].astype(x.dtype)
        return jnp.maximum(x, zero) + a * jnp.minimum(x, zero)

    sublanes = _sublanes_for(x.dtype)
    rows = total // _LANES
    x2 = x.reshape(rows, _LANES)  # free contiguous reshape, no copy

    if row_block is None:
        rb_target = _default_row_block(x.dtype, sublanes)
    else:
        rb_target = max(sublanes, _round_up(int(row_block), sublanes))
    rb = _pick_row_block(rows, sublanes, rb_target)
    grid = (pl.cdiv(rows, rb),)

    tile_spec = pl.BlockSpec((rb, _LANES), lambda i: (i, 0))
    out_shape = jax.ShapeDtypeStruct((rows, _LANES), x.dtype)
    cparams = pltpu.CompilerParams(dimension_semantics=("parallel",))

    if afunc == "relu":
        y2 = pl.pallas_call(
            _relu_kernel,
            out_shape=out_shape,
            grid_spec=pltpu.PrefetchScalarGridSpec(
                num_scalar_prefetch=0,
                grid=grid,
                in_specs=[tile_spec],
                out_specs=tile_spec,
            ),
            compiler_params=cparams,
            input_output_aliases=({0: 0} if donate else {}),
        )(x2)
    else:  # prelu
        # TODO(synk): only the single-parameter PReLU (nn.PReLU default,
        # num_parameters=1) is supported; per-channel weights would need the
        # channel axis kept separate from the lane-dense flatten.
        y2 = pl.pallas_call(
            _prelu_kernel,
            out_shape=out_shape,
            grid_spec=pltpu.PrefetchScalarGridSpec(
                num_scalar_prefetch=0,
                grid=grid,
                in_specs=[
                    pl.BlockSpec(memory_space=pltpu.MemorySpace.SMEM),  # alpha
                    tile_spec,
                ],
                out_specs=tile_spec,
            ),
            compiler_params=cparams,
            input_output_aliases=({1: 0} if donate else {}),
        )(alpha, x2)

    return y2.reshape(x.shape)  # free contiguous reshape back


if __name__ == "__main__":
    key = jax.random.PRNGKey(0)
    # Module-typical small activation tensor (N, C, H, W).
    x = jax.random.normal(key, (2, 4, 16, 16), dtype=jnp.float32)

    # ReLU (module default) — force the Pallas path even at this small size.
    out_relu = jax.block_until_ready(activation(x, "relu", min_pallas_elements=0))
    assert out_relu.shape == x.shape, out_relu.shape
    assert jnp.allclose(out_relu, jnp.maximum(x, 0.0), atol=1e-6, rtol=1e-6), "relu mismatch"

    # PReLU (single parameter, PyTorch default init 0.25).
    out_prelu = jax.block_until_ready(
        activation(x, "prelu", prelu_weight=0.25, min_pallas_elements=0))
    ref_prelu = jnp.maximum(x, 0.0) + 0.25 * jnp.minimum(x, 0.0)
    assert jnp.allclose(out_prelu, ref_prelu, atol=1e-6, rtol=1e-6), "prelu mismatch"

    # Identity path (afunc=None).
    out_id = jax.block_until_ready(activation(x, None))
    assert jnp.allclose(out_id, x), "identity mismatch"

    # Multi-step grid + ragged last row-block (rows=72, rb=16 -> grid=5, last
    # block only 8/16 rows valid) with no wrapper-side pad/slice.
    x2 = jax.random.normal(jax.random.PRNGKey(1), (2, 4, 9, 128), dtype=jnp.float32)
    out2 = jax.block_until_ready(
        activation(x2, "relu", row_block=16, min_pallas_elements=0))
    assert jnp.allclose(out2, jnp.maximum(x2, 0.0)), "ragged-grid relu mismatch"

    # bf16 path (dtype-aware sublane rounding: (16, 128) minimum tile).
    xb = jax.random.normal(jax.random.PRNGKey(2), (2, 4, 9, 128), dtype=jnp.bfloat16)
    outb = jax.block_until_ready(
        activation(xb, "relu", row_block=32, min_pallas_elements=0))
    assert jnp.allclose(outb, jnp.maximum(xb, 0)), "bf16 relu mismatch"

    # Non-lane-divisible total falls back to plain XLA elementwise.
    x3 = jax.random.normal(jax.random.PRNGKey(3), (3, 5, 7), dtype=jnp.float32)
    out3 = jax.block_until_ready(activation(x3, "relu"))
    assert jnp.allclose(out3, jnp.maximum(x3, 0.0)), "fallback relu mismatch"

    print("KERNEL_OK")
</pallas_src>

<mosaic_0001>
module attributes {stable_mosaic.version = 11 : i64} {
  func.func @_relu_kernel(%arg0: i32, %arg1: memref<16x128xf32, #tpu.memory_space<vmem>>, %arg2: memref<16x128xf32, #tpu.memory_space<vmem>>) attributes {dimension_semantics = [#tpu.dimension_semantics<parallel>], iteration_bounds = array<i64: 1>, scalar_prefetch = 0 : i64, scratch_operands = 0 : i64, tpu.core_type = #tpu.core_type<tc>, window_params = [{transform_indices = @transform_0, window_bounds = array<i64: 16, 128>}, {transform_indices = @transform_1, window_bounds = array<i64: 16, 128>}]} {
    %c0 = arith.constant 0 : index
    %c0_0 = arith.constant 0 : index
    %0 = vector.load %arg1[%c0, %c0_0] : memref<16x128xf32, #tpu.memory_space<vmem>>, vector<16x128xf32>
    %cst = arith.constant 0.000000e+00 : f32
    %1 = vector.broadcast %cst : f32 to vector<16x128xf32>
    %2 = arith.maximumf %0, %1 : vector<16x128xf32>
    %c0_1 = arith.constant 0 : index
    %c0_2 = arith.constant 0 : index
    %3 = vector.load %arg2[%c0_1, %c0_2] : memref<16x128xf32, #tpu.memory_space<vmem>>, vector<16x128xf32>
    tpu.vector_store %arg2[%c0_1, %c0_2], %2 {strides = array<i32>} : memref<16x128xf32, #tpu.memory_space<vmem>>, vector<16x128xf32>,
    return
  }
  func.func @transform_0(%arg0: i32) -> (i32, i32) {
    %c0_i32 = arith.constant 0 : i32
    %c0_i32_0 = arith.constant 0 : i32
    return %arg0, %c0_i32 : i32, i32
  }
  func.func @transform_1(%arg0: i32) -> (i32, i32) {
    %c0_i32 = arith.constant 0 : i32
    %c0_i32_0 = arith.constant 0 : i32
    return %arg0, %c0_i32 : i32, i32
  }
}

</mosaic_0001>

<bundles_post_ra>
// kernel: tpu_custom_call.1
= control target key start
LH: loop header
LB: loop body
LE: loop exit
PB: predicated region body
PF: predicated region fallthrough
CT: control target
= control target key end

     0   :  { %6 = vsyncpa [#allocation3], 0  ;;  %s126_s0 = inlined_call_operand.hbm [shape: f32[16,128], index: 0, kind: input, shape index: {}]   ;;  %s127_s1 = inlined_call_operand.hbm [shape: f32[16,128], index: 1, kind: output, shape index: {}]  }
   0x1   :  { %7 = vsyncpa [#allocation4], 0  ;;  %s12_s8 = sshll.u32 %s126_s0, 4  ;;  %s106_s9 = smov [#allocation2]   ;;  %s13_s8 = int_to_ptr.hbm [resolvable:$true] %s12_s8 }
   0x2   :  { %s14_s10 = sshll.u32 %s106_s9, 4  ;;  %s107_s11 = smov 128   ;;  %s15_s10 = int_to_ptr.vmem [resolvable:$true] %s14_s10 }
   0x3   :  { %s108_s12 = smov 8  }
   0x4   :  { %20 = dma.hbm_to_vmem [thread:$0]  %s13_s8, 256, %s15_s10, [#allocation3], %s107_s11, %s107_s11, %s108_s12  }
   0x5   :  { %102 = dma.done.wait [#allocation3], 256  }
   0x6   :  { %103 = vsyncadd [#allocation3], 4294967040  ;;  %s109_s13 = smov [#allocation5]   ;;  %s37_s17 = sshll.u32 %s127_s1, 4  ;;  %v25_v0 = vld [vmem:[#allocation2] sm:$0xff]  ;;  %v26_v1 = vld [vmem:[#allocation2 + $0x8] sm:$0xff]  ;;  %s38_s17 = int_to_ptr.hbm [resolvable:$true] %s37_s17 }
   0x7   :  { %s35_s14 = sshll.u32 %s109_s13, 4  ;;  %v27_v2 = vmax.f32 %v25_v0, 0.0  ;;  %v28_v3 = vmax.f32 %v26_v1, 0.0  ;;  %s36_s14 = int_to_ptr.vmem [resolvable:$true] %s35_s14 }
   0x9   :  { %29 = vst [vmem:[#allocation5] sm:$0xff] %v27_v2 }
   0xa   :  { %30 = vst [vmem:[#allocation5 + $0x8] sm:$0xff] %v28_v3 }
   0xb   :  { %43 = dma.vmem_to_hbm [thread:$0]  %s36_s14, 256, %s38_s17, [#allocation4], %s107_s11, %s107_s11, %s108_s12  }
   0xc   :  { %104 = dma.done.wait [#allocation4], 256  }
   0xd   :  { %105 = vsyncadd [#allocation4], 4294967040 }
   0xe   :  { %48 = vsyncpa [#allocation3], 1 }
   0xf   :  { %49 = vsyncpa [#allocation4], 1 }

</bundles_post_ra>
